<compile_context>
chip_gen: v7x
topology: tpu7x:2x2x1
jax: 0.10.0
libtpu: 0.0.40
codegen_flags: <defaults>
</compile_context>

<pallas_src>
import functools

import jax
import jax.numpy as jnp
import numpy as np
from jax.experimental import pallas as pl
from jax.experimental.pallas import tpu as pltpu


def _kernel(x_ref, we_ref, weff_ref, beff_ref, out_ref):
    # Shared bottom: H = relu(X @ We)
    h = jnp.maximum(
        jnp.dot(x_ref[...], we_ref[...], preferred_element_type=jnp.float32), 0.0
    )
    # All tasks in one MXU call (tower and head folded): (tile_n, R) @ (R, T) + (1, T)
    out_ref[...] = (
        jnp.dot(h, weff_ref[...], preferred_element_type=jnp.float32) + beff_ref[...]
    )


def _cost_estimate(n, f, r, t):
    flops = 2 * n * f * r + 2 * n * r * t
    bytes_accessed = 4 * (n * f + f * r + r * t + t + n * t)
    return pl.CostEstimate(flops=flops, transcendentals=0, bytes_accessed=bytes_accessed)


@functools.partial(jax.jit, static_argnames=("tile_n",))
def standar_optimization_forward(x, we, wt, bt, wo, bo, *, tile_n=512):
    """x: (N, F); we: (F, R); wt: (T, R, U); bt: (T, U); wo: (T, U, 1); bo: (T, 1).

    Returns an (N, T) float32 array; column t is task t's scalar output (== the module's
    output_list[t] squeezed)."""
    n, f = x.shape
    r = we.shape[1]
    num_tasks = wt.shape[0]

    # Fold the per-task tower (Linear R->U) and head (Linear U->1): no nonlinearity between
    # them, so O_t = H @ (Wt_t @ Wo_t) + (bt_t @ Wo_t + bo_t).  Exact up to FP summation order.
    w_eff = jnp.einsum("tru,tu->rt", wt, wo[..., 0])                    # (R, T)
    b_eff = (jnp.sum(bt * wo[..., 0], axis=1) + bo[:, 0]).reshape(1, num_tasks)

    ce = _cost_estimate(n, f, r, num_tasks)

    if n <= tile_n:
        # Tiny / single-block case: skip the grid machinery entirely (a 1-step grid buys no
        # pipelining, only per-step setup overhead).  Whole operands live in VMEM.
        out = pl.pallas_call(
            _kernel,
            out_shape=jax.ShapeDtypeStruct((n, num_tasks), jnp.float32),
            in_specs=[
                pl.BlockSpec(memory_space=pltpu.MemorySpace.VMEM),      # X
                pl.BlockSpec(memory_space=pltpu.MemorySpace.VMEM),      # expert kernels
                pl.BlockSpec(memory_space=pltpu.MemorySpace.VMEM),      # folded tower+head W
                pl.BlockSpec(memory_space=pltpu.MemorySpace.VMEM),      # folded bias row
            ],
            out_specs=pl.BlockSpec(memory_space=pltpu.MemorySpace.VMEM),
            cost_estimate=ce,
        )(x, we, w_eff, b_eff)
        return out

    # Batch-tiled path: pad N up to a multiple of tile_n (padding rows produce b_eff and are
    # sliced away), pipeline the X reads / (N, T) writes, keep the tiny weights resident.
    n_pad = pl.cdiv(n, tile_n) * tile_n
    x_p = jnp.pad(x, ((0, n_pad - n), (0, 0))) if n_pad != n else x

    out = pl.pallas_call(
        _kernel,
        out_shape=jax.ShapeDtypeStruct((n_pad, num_tasks), jnp.float32),
        grid_spec=pltpu.PrefetchScalarGridSpec(
            num_scalar_prefetch=0,
            grid=(n_pad // tile_n,),
            in_specs=[
                pl.BlockSpec((tile_n, f), lambda i: (i, 0)),            # X tile
                pl.BlockSpec((f, r), lambda i: (0, 0)),                 # expert kernels (resident)
                pl.BlockSpec((r, num_tasks), lambda i: (0, 0)),         # folded W (resident)
                pl.BlockSpec((1, num_tasks), lambda i: (0, 0)),         # folded bias (resident)
            ],
            out_specs=pl.BlockSpec((tile_n, num_tasks), lambda i: (i, 0)),  # lane-merged (tile, T)
        ),
        compiler_params=pltpu.CompilerParams(
            dimension_semantics=("parallel",),                          # megacore / v7x 2-TC split
        ),
        cost_estimate=ce,
    )(x_p, we, w_eff, b_eff)
    return out[:n]


def reference_forward(x, we, wt, bt, wo, bo):
    """Literal translation of the PyTorch forward (two separate linears per task)."""
    h = jnp.maximum(x @ we, 0.0)
    outs = []
    for t in range(wt.shape[0]):
        tt = h @ wt[t] + bt[t]
        outs.append(tt @ wo[t] + bo[t])                                 # (N, 1)
    return jnp.concatenate(outs, axis=1)                                # (N, T)


def _make_params(key, num_features, runits0, num_units, num_tasks):
    ke, kwt, kbt, kwo, kbo = jax.random.split(key, 5)
    # sharedBottom.expert_kernels = torch.rand(num_features, runits[0]) -> U[0, 1)
    we = jax.random.uniform(ke, (num_features, runits0), dtype=jnp.float32)
    # towers_list[t] = nn.Linear(runits[0], num_units); stored as (in, out) = W.T
    lim_t = 1.0 / np.sqrt(runits0)
    wt = jax.random.uniform(kwt, (num_tasks, runits0, num_units),
                            minval=-lim_t, maxval=lim_t, dtype=jnp.float32)
    bt = jax.random.uniform(kbt, (num_tasks, num_units),
                            minval=-lim_t, maxval=lim_t, dtype=jnp.float32)
    # output_list[t] = nn.Linear(num_units, 1); stored as (in, out) = W.T
    lim_o = 1.0 / np.sqrt(num_units)
    wo = jax.random.uniform(kwo, (num_tasks, num_units, 1),
                            minval=-lim_o, maxval=lim_o, dtype=jnp.float32)
    bo = jax.random.uniform(kbo, (num_tasks, 1),
                            minval=-lim_o, maxval=lim_o, dtype=jnp.float32)
    return we, wt, bt, wo, bo


if __name__ == "__main__":
    # Module hyper-parameters (learning_type=None, seqlen=None, data not in {'mimic','pcba'}):
    #   num_features=32, runits=[32], num_units=8, num_tasks=3
    num_features = 32
    runits0 = 32
    num_units = 8
    num_tasks = 3

    key = jax.random.PRNGKey(0)
    kx1, kx2, kp = jax.random.split(key, 3)
    we, wt, bt, wo, bo = _make_params(kp, num_features, runits0, num_units, num_tasks)

    # --- 1) module-sized batch: exercises the gridless (single VMEM block) path ---
    batch = 8
    x = jax.random.normal(kx1, (batch, num_features), dtype=jnp.float32)
    out = jax.block_until_ready(standar_optimization_forward(x, we, wt, bt, wo, bo))
    ref = jax.block_until_ready(reference_forward(x, we, wt, bt, wo, bo))
    np.testing.assert_allclose(np.asarray(out), np.asarray(ref), rtol=1e-5, atol=1e-5)

    # Module returns a Python list of per-task (batch, 1) tensors:
    output_list = [out[:, t:t + 1] for t in range(num_tasks)]
    assert all(o.shape == (batch, 1) for o in output_list)

    # --- 2) larger, non-multiple-of-tile batch: exercises the batch-tiled pipelined path ---
    batch_big = 1000
    x_big = jax.random.normal(kx2, (batch_big, num_features), dtype=jnp.float32)
    out_big = jax.block_until_ready(standar_optimization_forward(x_big, we, wt, bt, wo, bo))
    ref_big = jax.block_until_ready(reference_forward(x_big, we, wt, bt, wo, bo))
    assert out_big.shape == (batch_big, num_tasks)
    np.testing.assert_allclose(np.asarray(out_big), np.asarray(ref_big), rtol=1e-5, atol=1e-5)

    print("KERNEL_OK")
</pallas_src>

<mosaic_0001>
module attributes {stable_mosaic.version = 11 : i64} {
  func.func @_kernel(%arg0: memref<8x32xf32, #tpu.memory_space<vmem>>, %arg1: memref<32x32xf32, #tpu.memory_space<vmem>>, %arg2: memref<32x3xf32, #tpu.memory_space<vmem>>, %arg3: memref<1x3xf32, #tpu.memory_space<vmem>>, %arg4: memref<8x3xf32, #tpu.memory_space<vmem>>) attributes {dimension_semantics = [], scalar_prefetch = 0 : i64, scratch_operands = 0 : i64, tpu.core_type = #tpu.core_type<tc>} {
    %c0 = arith.constant 0 : index
    %c0_0 = arith.constant 0 : index
    %0 = vector.load %arg0[%c0, %c0_0] : memref<8x32xf32, #tpu.memory_space<vmem>>, vector<8x32xf32>
    %c0_1 = arith.constant 0 : index
    %c0_2 = arith.constant 0 : index
    %1 = vector.load %arg1[%c0_1, %c0_2] : memref<32x32xf32, #tpu.memory_space<vmem>>, vector<32x32xf32>
    %cst = arith.constant dense<0.000000e+00> : vector<8x32xf32>
    %2 = tpu.matmul %0, %1, %cst {dimension_numbers = #tpu.dot_dimension_numbers<[1], [0], [0], [1], [0, 0, 1, 1], [], []>} : vector<8x32xf32>, vector<32x32xf32>, vector<8x32xf32> -> vector<8x32xf32>
    %cst_3 = arith.constant 0.000000e+00 : f32
    %3 = vector.broadcast %cst_3 : f32 to vector<8x32xf32>
    %4 = arith.maximumf %2, %3 : vector<8x32xf32>
    %c0_4 = arith.constant 0 : index
    %c0_5 = arith.constant 0 : index
    %5 = vector.load %arg2[%c0_4, %c0_5] : memref<32x3xf32, #tpu.memory_space<vmem>>, vector<32x3xf32>
    %cst_6 = arith.constant dense<0.000000e+00> : vector<8x3xf32>
    %6 = tpu.matmul %4, %5, %cst_6 {dimension_numbers = #tpu.dot_dimension_numbers<[1], [0], [0], [1], [0, 0, 1, 1], [], []>} : vector<8x32xf32>, vector<32x3xf32>, vector<8x3xf32> -> vector<8x3xf32>
    %c0_7 = arith.constant 0 : index
    %c0_8 = arith.constant 0 : index
    %7 = vector.load %arg3[%c0_7, %c0_8] : memref<1x3xf32, #tpu.memory_space<vmem>>, vector<1x3xf32>
    %8 = vector.broadcast %7 : vector<1x3xf32> to vector<8x3xf32>
    %9 = arith.addf %6, %8 : vector<8x3xf32>
    %c0_9 = arith.constant 0 : index
    %c0_10 = arith.constant 0 : index
    %10 = vector.load %arg4[%c0_9, %c0_10] : memref<8x3xf32, #tpu.memory_space<vmem>>, vector<8x3xf32>
    tpu.vector_store %arg4[%c0_9, %c0_10], %9 {strides = array<i32>} : memref<8x3xf32, #tpu.memory_space<vmem>>, vector<8x3xf32>,
    return
  }
}

</mosaic_0001>

<bundles_post_ra>
// kernel: standar_optimization_forward.1
= control target key start
LH: loop header
LB: loop body
LE: loop exit
PB: predicated region body
PF: predicated region fallthrough
CT: control target
= control target key end

     0   :  { %v237_v0 = vmov 0.0|0.0   ;;  %vm238_vm0 = vmmov 0   ;;  %v239_v4 = vmov 0.0   ;;  %vm22_vm1 = vcmask 261120   ;;  %s298_s1 = inlined_call_operand.vmem [shape: f32[32,32], index: 1, kind: input, shape index: {}]   ;;  %s299_s2 = inlined_call_operand.vmem [shape: f32[32,3], index: 2, kind: input, shape index: {}]   ;;  %s300_s0 = inlined_call_operand.vmem [shape: f32[8,32], index: 0, kind: input, shape index: {}]   ;;  %s301_s3 = inlined_call_operand.vmem [shape: f32[1,3], index: 3, kind: input, shape index: {}]   ;;  %s302_s4 = inlined_call_operand.vmem [shape: f32[8,3], index: 4, kind: output, shape index: {}]  }
   0x1   :  { %222 = vmatprep.subr.bf16.mxu0 %v237_v0  ;;  %v18_v1 = vld [vmem:[%s298_s1] sm:$0xff]  ;;  %v19_v2 = vld [vmem:[%s298_s1 + $0x8] sm:$0xff]  ;;  %v20_v3 = vld [vmem:[%s298_s1 + $0x10] sm:$0xff]  ;;  %208 = vmatprep.mubr.msk.f32.mxu0 %vm238_vm0, %v239_v4  ;;  %vm181_vm2 = vcmask 23552  }
   0x2   :  { %v223_v5 = vpack.c.bf16 %v19_v2, %v18_v1  ;;  %v21_v6 = vld [vmem:[%s298_s1 + $0x18] sm:$0xff]  ;;  %228 = vmatprep.subr.bf16.mxu1 %v237_v0  ;;  %v97_v7 = vld [vmem:[%s299_s2] sm:$0xff]  ;;  %219 = vmatprep.mubr.msk.f32.mxu1 %vm238_vm0, %v239_v4  ;;  %v98_v8 = vld [vmem:[%s299_s2 + $0x8] sm:$0xff] }
   0x3   :  { %v226_v9 = vpack.c.bf16 %v21_v6, %v20_v3  ;;  %v229_v10 = vpack.c.bf16 %v98_v8, %v97_v7  ;;  %v17_v11 = vld [vmem:[%s300_s0] sm:$0xff]  ;;  %v99_v12 = vld [vmem:[%s299_s2 + $0x10] sm:$0xff]  ;;  %v100_v13 = vld [vmem:[%s299_s2 + $0x18] sm:$0xff] }
   0x4   :  { %224 = vmatpush3.bf16.msra.mxu0 %v223_v5  ;;  %v232_v14 = vpack.c.bf16 %v100_v13, %v99_v12  ;;  %v188_v18 = vld [vmem:[%s301_s3] ss:$0 sm:$0xff] }
   0x5   :  { %225 = vmatprep.subr.bf16.mxu0 %v237_v0  ;;  %230 = vmatpush3.bf16.msra.mxu1 %v229_v10 }
   0x6   :  { %231 = vmatprep.subr.bf16.mxu1 %v237_v0 }
   0x8   :  { %227 = vmatpush3.bf16.msra.mxu0 %v226_v9 }
   0x9   :  { %233 = vmatpush3.bf16.msra.mxu1 %v232_v14 }
   0xb   :  { %209 = vmatmul.mubr.msk.f32.vlgmr.msra.gmra.mrb[0].mxu0 %vm22_vm1, %v17_v11 }
  0xde   :  { %v92_v15 = vpop.f32.mrb[0].mxu0 }
  0xdf   :  { %v96_v16 = vmax.f32 %v92_v15, 0.0  ;;  %v210_v17 = vpop.f32.mrb[1].mxu0 }
  0xe1   :  { %220 = vmatmul.mubr.msk.f32.vlgmr.msra.gmra.mrb[0].mxu1 %vm22_vm1, %v96_v16 }
 0x1b4   :  { %v177_v19 = vpop.f32.mrb[0].mxu1 }
 0x1b5   :  { %v178_v20 = vadd.f32 %v188_v18, %v177_v19  ;;  %v221_v21 = vpop.f32.mrb[1].mxu1 }
 0x1b7   :  { %182 = vst.msk [vmem:[%s302_s4] sm:$0xff] %vm181_vm2, %v178_v20 }

</bundles_post_ra>
